<compile_context>
chip_gen: v5e
topology: v5e:2x2
jax: 0.10.0
libtpu: 0.0.40
codegen_flags: <defaults>
</compile_context>

<pallas_src>
import functools

import jax
import jax.numpy as jnp
from jax.experimental import pallas as pl
from jax.experimental.pallas import tpu as pltpu


# ----------------------------- kernel helpers -----------------------------

def _layernorm(x, gamma, beta, eps=1e-6):
    # x: (R, C), gamma/beta: (1, C). Biased variance, matching nn.LayerNorm(eps=1e-6).
    mean = jnp.mean(x, axis=-1, keepdims=True)
    xc = x - mean
    var = jnp.mean(xc * xc, axis=-1, keepdims=True)
    return xc * jax.lax.rsqrt(var + eps) * gamma + beta


def _gelu(x, use_tanh):
    if use_tanh:
        # tanh approximation -> EUP slot (nearly free on v6e/v7x); small
        # (~1e-3) deviation from the module's exact-erf GELU.
        c = 0.7978845608028654  # sqrt(2/pi)
        return 0.5 * x * (1.0 + jnp.tanh(c * (x + 0.044715 * x * x * x)))
    # nn.GELU() default: exact erf formulation (f32 VPU polynomial).
    return 0.5 * x * (1.0 + jax.lax.erf(x * 0.7071067811865476))


# ------------------------------- the kernel -------------------------------

def block_kernel(num_heads, gelu_tanh,
                 x_ref, bias_ref,
                 g1_ref, b1_ref, wqkv_ref, bqkv_ref, wproj_ref, bproj_ref,
                 g2_ref, b2_ref, wfc1_ref, bfc1_ref, wfc2_ref, bfc2_ref,
                 o_ref, ctx_scratch):
    _, N, C = x_ref.shape                 # block is (1, N, C)
    H = num_heads
    Dh = C // H
    bf16 = jnp.bfloat16

    x = x_ref[...].reshape(N, C)          # (N, C) f32 residual stream
    bias = bias_ref[...].reshape(1, N)    # (1, N) f32 additive key-padding bias

    # ---------------- attention branch ----------------
    xn = _layernorm(x, g1_ref[...], b1_ref[...])
    qkv = jnp.dot(xn.astype(bf16), wqkv_ref[...],
                  preferred_element_type=jnp.float32) + bqkv_ref[...]   # (N, 3C) f32
    # Attention scale already folded into the q columns of wqkv/bqkv (wrapper).
    q2d = qkv[:, 0:C].astype(bf16)
    k2d = qkv[:, C:2 * C].astype(bf16)
    v2d = qkv[:, 2 * C:3 * C].astype(bf16)

    # Per-head attention: lane slices fed straight into 2-D MXU dot_generals;
    # no (H, N, Dh) stack is materialized.  Context lands in a VMEM scratch
    # slab at the head's lane offset, so only one (N, N) score slab is live.
    for h in range(H):
        lo = h * Dh
        qh = q2d[:, lo:lo + Dh]           # (N, Dh) bf16
        kh = k2d[:, lo:lo + Dh]
        vh = v2d[:, lo:lo + Dh]

        # q @ k^T via contraction on the last dims (no explicit transpose).
        s = jax.lax.dot_general(qh, kh, (((1,), (1,)), ((), ())),
                                preferred_element_type=jnp.float32)     # (N, N) f32
        s = s + bias                       # broadcast over query rows
        s = s - jnp.max(s, axis=-1, keepdims=True)
        e = jnp.exp(s)
        denom = jnp.sum(e, axis=-1, keepdims=True)
        p = e * pl.reciprocal(denom, approx=True)                       # softmax, f32

        ctx_scratch[:, lo:lo + Dh] = jnp.dot(p.astype(bf16), vh,
                                             preferred_element_type=jnp.float32)

    attn_out = jnp.dot(ctx_scratch[...].astype(bf16), wproj_ref[...],
                       preferred_element_type=jnp.float32) + bproj_ref[...]
    x1 = x + attn_out

    # ------------------- MLP branch --------------------
    xn2 = _layernorm(x1, g2_ref[...], b2_ref[...])
    h1 = jnp.dot(xn2.astype(bf16), wfc1_ref[...],
                 preferred_element_type=jnp.float32) + bfc1_ref[...]
    h1 = _gelu(h1, gelu_tanh)
    h2 = jnp.dot(h1.astype(bf16), wfc2_ref[...],
                 preferred_element_type=jnp.float32) + bfc2_ref[...]

    o_ref[...] = (x1 + h2).reshape(1, N, C).astype(o_ref.dtype)


# ------------------------------- wrapper -----------------------------------

def transformer_block(x, key_padding_mask, params, num_heads, *, gelu_tanh=False):
    """x: (B, N, C) float; key_padding_mask: (B, N) bool (True = padded key)."""
    B, N, C = x.shape
    assert C % num_heads == 0, "dim must be divisible by num_heads"
    Dh = C // num_heads
    scale = Dh ** (-0.5)
    H1 = params["wfc1"].shape[1]

    f32, bf16 = jnp.float32, jnp.bfloat16
    xf = x.astype(f32)

    # Additive attention bias: -1e30 on padded keys (large finite value avoids
    # the -inf -> NaN path for fully padded rows; exp underflows to exactly 0).
    attn_bias = jnp.where(key_padding_mask, -1e30, 0.0).astype(f32).reshape(B, 1, N)

    # Fold the attention scale into the q columns of the QKV projection (free).
    wqkv = params["wqkv"].astype(f32).at[:, :C].multiply(scale)
    bqkv = params["bqkv"].astype(f32).at[:, :C].multiply(scale)

    # MXU operands in bf16 (f32 accumulation in-kernel); everything else f32.
    w = dict(
        g1=params["g1"].astype(f32), b1=params["b1"].astype(f32),
        wqkv=wqkv.astype(bf16), bqkv=bqkv,
        wproj=params["wproj"].astype(bf16), bproj=params["bproj"].astype(f32),
        g2=params["g2"].astype(f32), b2=params["b2"].astype(f32),
        wfc1=params["wfc1"].astype(bf16), bfc1=params["bfc1"].astype(f32),
        wfc2=params["wfc2"].astype(bf16), bfc2=params["bfc2"].astype(f32),
    )

    def rep_spec(shape):
        # Grid-invariant (resident) block covering the whole array.
        return pl.BlockSpec(shape, lambda b, _n=len(shape): (0,) * _n)

    in_specs = [
        pl.BlockSpec((1, N, C), lambda b: (b, 0, 0)),      # x
        pl.BlockSpec((1, 1, N), lambda b: (b, 0, 0)),      # additive key-padding bias
        rep_spec((1, C)), rep_spec((1, C)),                # ln1 gamma/beta
        rep_spec((C, 3 * C)), rep_spec((1, 3 * C)),        # qkv W^T (bf16), b (f32)
        rep_spec((C, C)), rep_spec((1, C)),                # proj W^T (bf16), b (f32)
        rep_spec((1, C)), rep_spec((1, C)),                # ln2 gamma/beta
        rep_spec((C, H1)), rep_spec((1, H1)),              # fc1 W^T (bf16), b (f32)
        rep_spec((H1, C)), rep_spec((1, C)),               # fc2 W^T (bf16), b (f32)
    ]

    # VMEM budget: double-buffered resident bf16 weights + per-step activation
    # slab (qkv / h1 / scores / ctx ...).  Never request less than the default.
    weight_bytes = 2 * (C * 3 * C + C * C + 2 * C * H1)
    act_bytes = 4 * N * (24 * C + 3 * H1) + 4 * 2 * N * N
    vmem_limit = int(min(max(2 * weight_bytes + 2 * act_bytes + (8 << 20), 32 << 20),
                         100 << 20))

    # Advisory cost estimate for XLA's scheduler around the custom call.
    flops = int(B * N * (8 * C * C + 4 * C * H1 + 4 * N * C))
    transcendentals = int(B * (num_heads * N * N + N * H1 + 4 * N))
    bytes_accessed = int(8 * B * N * C + 2 * 12 * C * C + 4 * B * N)

    kernel = functools.partial(block_kernel, num_heads, gelu_tanh)

    return pl.pallas_call(
        kernel,
        out_shape=jax.ShapeDtypeStruct((B, N, C), xf.dtype),
        grid_spec=pltpu.PrefetchScalarGridSpec(
            num_scalar_prefetch=0,
            grid=(B,),                                     # >=2 parallel steps when B>=2
            in_specs=in_specs,
            out_specs=pl.BlockSpec((1, N, C), lambda b: (b, 0, 0)),
            scratch_shapes=[pltpu.VMEM((N, C), jnp.float32)],   # per-step context slab
        ),
        compiler_params=pltpu.CompilerParams(
            dimension_semantics=("parallel",),
            vmem_limit_bytes=vmem_limit,
        ),
        cost_estimate=pl.CostEstimate(flops=flops,
                                      transcendentals=transcendentals,
                                      bytes_accessed=bytes_accessed),
        input_output_aliases={0: 0},                       # out reuses x's HBM buffer
    )(xf, attn_bias,
      w["g1"], w["b1"], w["wqkv"], w["bqkv"], w["wproj"], w["bproj"],
      w["g2"], w["b2"], w["wfc1"], w["bfc1"], w["wfc2"], w["bfc2"])


# --------------------------- pure-JAX reference -----------------------------

def ref_block(x, key_padding_mask, p, num_heads):
    def ln(t, g, b):
        m = jnp.mean(t, -1, keepdims=True)
        v = jnp.mean((t - m) ** 2, -1, keepdims=True)
        return (t - m) / jnp.sqrt(v + 1e-6) * g + b

    B, N, C = x.shape
    Dh = C // num_heads
    scale = Dh ** (-0.5)

    xn = ln(x, p["g1"], p["b1"])
    qkv = xn @ p["wqkv"] + p["bqkv"]
    qkv = qkv.reshape(B, N, 3, num_heads, Dh).transpose(2, 0, 3, 1, 4)
    q, k, v = qkv[0], qkv[1], qkv[2]
    attn = jnp.einsum("bhnd,bhmd->bhnm", q, k) * scale
    attn = jnp.where(key_padding_mask[:, None, None, :], -jnp.inf, attn)
    attn = jax.nn.softmax(attn, axis=-1)
    out = jnp.einsum("bhnm,bhmd->bhnd", attn, v).transpose(0, 2, 1, 3).reshape(B, N, C)
    out = out @ p["wproj"] + p["bproj"]
    x1 = x + out
    xn2 = ln(x1, p["g2"], p["b2"])
    h = jax.nn.gelu(xn2 @ p["wfc1"] + p["bfc1"], approximate=False)
    return x1 + h @ p["wfc2"] + p["bfc2"]


# ----------------------------------- main -----------------------------------

if __name__ == "__main__":
    # NOTE: toy shapes (N=8, C=32) do not exercise the (8,128) lane constraint;
    # production validation should use C (and ideally N) as multiples of 128.
    B, N, C = 2, 8, 32
    num_heads = 4
    mlp_ratio = 4.0
    H1 = int(C * mlp_ratio)  # 128

    key = jax.random.PRNGKey(0)
    ks = jax.random.split(key, 16)

    params = {
        # LayerNorm 1
        "g1": 1.0 + 0.1 * jax.random.normal(ks[0], (1, C), jnp.float32),
        "b1": 0.1 * jax.random.normal(ks[1], (1, C), jnp.float32),
        # Attention: stored as W^T (in_features, out_features) so kernel does x @ W^T
        "wqkv": 0.05 * jax.random.normal(ks[2], (C, 3 * C), jnp.float32),
        "bqkv": 0.05 * jax.random.normal(ks[3], (1, 3 * C), jnp.float32),
        "wproj": 0.05 * jax.random.normal(ks[4], (C, C), jnp.float32),
        "bproj": 0.05 * jax.random.normal(ks[5], (1, C), jnp.float32),
        # LayerNorm 2
        "g2": 1.0 + 0.1 * jax.random.normal(ks[6], (1, C), jnp.float32),
        "b2": 0.1 * jax.random.normal(ks[7], (1, C), jnp.float32),
        # MLP
        "wfc1": 0.05 * jax.random.normal(ks[8], (C, H1), jnp.float32),
        "bfc1": 0.05 * jax.random.normal(ks[9], (1, H1), jnp.float32),
        "wfc2": 0.05 * jax.random.normal(ks[10], (H1, C), jnp.float32),
        "bfc2": 0.05 * jax.random.normal(ks[11], (1, C), jnp.float32),
    }

    x = jax.random.normal(ks[12], (B, N, C), jnp.float32)

    # Case 1: no padding (equivalent to key_padding_mask=None in PyTorch).
    mask_none = jnp.zeros((B, N), dtype=bool)
    # Case 2: last two keys of batch element 1 are padded.
    mask_pad = mask_none.at[1, N - 2:].set(True)

    # bf16 MXU matmuls + approx reciprocal introduce small quantization error
    # vs. the pure-f32 reference -> loose-ish tolerance.
    ATOL = RTOL = 2e-2

    for mask in (mask_none, mask_pad):
        expected = ref_block(x, mask, params, num_heads)

        out = jax.block_until_ready(
            transformer_block(x, mask, params, num_heads))
        assert out.shape == (B, N, C)
        err = jnp.max(jnp.abs(out - expected))
        assert jnp.allclose(out, expected, atol=ATOL, rtol=RTOL), (
            f"exact-gelu: max abs err {err}")

        # tanh-GELU fast path (EUP offload on v6e/v7x); compare against the
        # exact-erf reference with a slightly looser tolerance.
        out_t = jax.block_until_ready(
            transformer_block(x, mask, params, num_heads, gelu_tanh=True))
        err_t = jnp.max(jnp.abs(out_t - expected))
        assert jnp.allclose(out_t, expected, atol=5e-2, rtol=5e-2), (
            f"tanh-gelu: max abs err {err_t}")

    print("KERNEL_OK")
</pallas_src>

<mosaic_0001>
module attributes {stable_mosaic.version = 11 : i64} {
  func.func @block_kernel(%arg0: i32, %arg1: memref<1x8x32xf32, #tpu.memory_space<vmem>>, %arg2: memref<1x1x8xf32, #tpu.memory_space<vmem>>, %arg3: memref<1x32xf32, #tpu.memory_space<vmem>>, %arg4: memref<1x32xf32, #tpu.memory_space<vmem>>, %arg5: memref<32x96xbf16, #tpu.memory_space<vmem>>, %arg6: memref<1x96xf32, #tpu.memory_space<vmem>>, %arg7: memref<32x32xbf16, #tpu.memory_space<vmem>>, %arg8: memref<1x32xf32, #tpu.memory_space<vmem>>, %arg9: memref<1x32xf32, #tpu.memory_space<vmem>>, %arg10: memref<1x32xf32, #tpu.memory_space<vmem>>, %arg11: memref<32x128xbf16, #tpu.memory_space<vmem>>, %arg12: memref<1x128xf32, #tpu.memory_space<vmem>>, %arg13: memref<128x32xbf16, #tpu.memory_space<vmem>>, %arg14: memref<1x32xf32, #tpu.memory_space<vmem>>, %arg15: memref<1x8x32xf32, #tpu.memory_space<vmem>>, %arg16: memref<8x32xf32, #tpu.memory_space<vmem>>) attributes {dimension_semantics = [#tpu.dimension_semantics<parallel>], iteration_bounds = array<i64: 2>, scalar_prefetch = 0 : i64, scratch_operands = 1 : i64, tpu.core_type = #tpu.core_type<tc>, window_params = [{transform_indices = @transform_0, window_bounds = array<i64: 1, 8, 32>}, {transform_indices = @transform_1, window_bounds = array<i64: 1, 1, 8>}, {pipeline_mode = #tpu.pipeline_mode<synchronous>, transform_indices = @transform_2, window_bounds = array<i64: 1, 32>}, {pipeline_mode = #tpu.pipeline_mode<synchronous>, transform_indices = @transform_3, window_bounds = array<i64: 1, 32>}, {pipeline_mode = #tpu.pipeline_mode<synchronous>, transform_indices = @transform_4, window_bounds = array<i64: 32, 96>}, {pipeline_mode = #tpu.pipeline_mode<synchronous>, transform_indices = @transform_5, window_bounds = array<i64: 1, 96>}, {pipeline_mode = #tpu.pipeline_mode<synchronous>, transform_indices = @transform_6, window_bounds = array<i64: 32, 32>}, {pipeline_mode = #tpu.pipeline_mode<synchronous>, transform_indices = @transform_7, window_bounds = array<i64: 1, 32>}, {pipeline_mode = #tpu.pipeline_mode<synchronous>, transform_indices = @transform_8, window_bounds = array<i64: 1, 32>}, {pipeline_mode = #tpu.pipeline_mode<synchronous>, transform_indices = @transform_9, window_bounds = array<i64: 1, 32>}, {pipeline_mode = #tpu.pipeline_mode<synchronous>, transform_indices = @transform_10, window_bounds = array<i64: 32, 128>}, {pipeline_mode = #tpu.pipeline_mode<synchronous>, transform_indices = @transform_11, window_bounds = array<i64: 1, 128>}, {pipeline_mode = #tpu.pipeline_mode<synchronous>, transform_indices = @transform_12, window_bounds = array<i64: 128, 32>}, {pipeline_mode = #tpu.pipeline_mode<synchronous>, transform_indices = @transform_13, window_bounds = array<i64: 1, 32>}, {transform_indices = @transform_14, window_bounds = array<i64: 1, 8, 32>}]} {
    %c0 = arith.constant 0 : index
    %c0_0 = arith.constant 0 : index
    %c0_1 = arith.constant 0 : index
    %0 = vector.load %arg1[%c0, %c0_0, %c0_1] : memref<1x8x32xf32, #tpu.memory_space<vmem>>, vector<1x8x32xf32>
    %1 = vector.shape_cast %0 : vector<1x8x32xf32> to vector<8x32xf32>
    %c0_2 = arith.constant 0 : index
    %c0_3 = arith.constant 0 : index
    %c0_4 = arith.constant 0 : index
    %2 = vector.load %arg2[%c0_2, %c0_3, %c0_4] : memref<1x1x8xf32, #tpu.memory_space<vmem>>, vector<1x1x8xf32>
    %3 = vector.shape_cast %2 : vector<1x1x8xf32> to vector<1x8xf32>
    %c0_5 = arith.constant 0 : index
    %c0_6 = arith.constant 0 : index
    %4 = vector.load %arg3[%c0_5, %c0_6] : memref<1x32xf32, #tpu.memory_space<vmem>>, vector<1x32xf32>
    %c0_7 = arith.constant 0 : index
    %c0_8 = arith.constant 0 : index
    %5 = vector.load %arg4[%c0_7, %c0_8] : memref<1x32xf32, #tpu.memory_space<vmem>>, vector<1x32xf32>
    %cst = arith.constant dense<0.000000e+00> : vector<8xf32>
    %6 = vector.multi_reduction <add>, %1, %cst [1] : vector<8x32xf32> to vector<8xf32>
    %7 = vector.shape_cast %6 : vector<8xf32> to vector<8x1xf32>
    %cst_9 = arith.constant 3.200000e+01 : f32
    %8 = vector.broadcast %cst_9 : f32 to vector<8x1xf32>
    %9 = arith.divf %7, %8 : vector<8x1xf32>
    %10 = vector.broadcast %9 : vector<8x1xf32> to vector<8x32xf32>
    %11 = arith.subf %1, %10 : vector<8x32xf32>
    %12 = arith.mulf %11, %11 : vector<8x32xf32>
    %cst_10 = arith.constant dense<0.000000e+00> : vector<8xf32>
    %13 = vector.multi_reduction <add>, %12, %cst_10 [1] : vector<8x32xf32> to vector<8xf32>
    %14 = vector.shape_cast %13 : vector<8xf32> to vector<8x1xf32>
    %cst_11 = arith.constant 3.200000e+01 : f32
    %15 = vector.broadcast %cst_11 : f32 to vector<8x1xf32>
    %16 = arith.divf %14, %15 : vector<8x1xf32>
    %cst_12 = arith.constant 9.99999997E-7 : f32
    %17 = vector.broadcast %cst_12 : f32 to vector<8x1xf32>
    %18 = arith.addf %16, %17 : vector<8x1xf32>
    %19 = math.rsqrt %18 : vector<8x1xf32>
    %20 = vector.broadcast %19 : vector<8x1xf32> to vector<8x32xf32>
    %21 = arith.mulf %11, %20 : vector<8x32xf32>
    %22 = vector.broadcast %4 : vector<1x32xf32> to vector<8x32xf32>
    %23 = arith.mulf %21, %22 : vector<8x32xf32>
    %24 = vector.broadcast %5 : vector<1x32xf32> to vector<8x32xf32>
    %25 = arith.addf %23, %24 : vector<8x32xf32>
    %26 = arith.truncf %25 : vector<8x32xf32> to vector<8x32xbf16>
    %c0_13 = arith.constant 0 : index
    %c0_14 = arith.constant 0 : index
    %27 = vector.load %arg5[%c0_13, %c0_14] : memref<32x96xbf16, #tpu.memory_space<vmem>>, vector<32x96xbf16>
    %cst_15 = arith.constant dense<0.000000e+00> : vector<8x96xf32>
    %28 = tpu.matmul %26, %27, %cst_15 {dimension_numbers = #tpu.dot_dimension_numbers<[1], [0], [0], [1], [0, 0, 1, 1], [], []>} : vector<8x32xbf16>, vector<32x96xbf16>, vector<8x96xf32> -> vector<8x96xf32>
    %c0_16 = arith.constant 0 : index
    %c0_17 = arith.constant 0 : index
    %29 = vector.load %arg6[%c0_16, %c0_17] : memref<1x96xf32, #tpu.memory_space<vmem>>, vector<1x96xf32>
    %30 = vector.broadcast %29 : vector<1x96xf32> to vector<8x96xf32>
    %31 = arith.addf %28, %30 : vector<8x96xf32>
    %32 = vector.extract_strided_slice %31 {offsets = [0, 0], sizes = [8, 32], strides = [1, 1]} : vector<8x96xf32> to vector<8x32xf32>
    %33 = arith.truncf %32 : vector<8x32xf32> to vector<8x32xbf16>
    %34 = vector.extract_strided_slice %31 {offsets = [0, 32], sizes = [8, 32], strides = [1, 1]} : vector<8x96xf32> to vector<8x32xf32>
    %35 = arith.truncf %34 : vector<8x32xf32> to vector<8x32xbf16>
    %36 = vector.extract_strided_slice %31 {offsets = [0, 64], sizes = [8, 32], strides = [1, 1]} : vector<8x96xf32> to vector<8x32xf32>
    %37 = arith.truncf %36 : vector<8x32xf32> to vector<8x32xbf16>
    %38 = vector.extract_strided_slice %33 {offsets = [0, 0], sizes = [8, 8], strides = [1, 1]} : vector<8x32xbf16> to vector<8x8xbf16>
    %39 = vector.extract_strided_slice %35 {offsets = [0, 0], sizes = [8, 8], strides = [1, 1]} : vector<8x32xbf16> to vector<8x8xbf16>
    %40 = vector.extract_strided_slice %37 {offsets = [0, 0], sizes = [8, 8], strides = [1, 1]} : vector<8x32xbf16> to vector<8x8xbf16>
    %cst_18 = arith.constant dense<0.000000e+00> : vector<8x8xf32>
    %41 = tpu.matmul %38, %39, %cst_18 {dimension_numbers = #tpu.dot_dimension_numbers<[1], [1], [0], [0], [0, 0, 1, 0], [], []>} : vector<8x8xbf16>, vector<8x8xbf16>, vector<8x8xf32> -> vector<8x8xf32>
    %42 = vector.broadcast %3 : vector<1x8xf32> to vector<8x8xf32>
    %43 = arith.addf %41, %42 : vector<8x8xf32>
    %cst_19 = arith.constant dense<0xFF800000> : vector<8xf32>
    %44 = vector.multi_reduction <maximumf>, %43, %cst_19 [1] : vector<8x8xf32> to vector<8xf32>
    %45 = vector.shape_cast %44 : vector<8xf32> to vector<8x1xf32>
    %46 = vector.broadcast %45 : vector<8x1xf32> to vector<8x8xf32>
    %47 = arith.subf %43, %46 : vector<8x8xf32>
    %48 = math.exp %47 : vector<8x8xf32>
    %cst_20 = arith.constant dense<0.000000e+00> : vector<8xf32>
    %49 = vector.multi_reduction <add>, %48, %cst_20 [1] : vector<8x8xf32> to vector<8xf32>
    %50 = vector.shape_cast %49 : vector<8xf32> to vector<8x1xf32>
    %51 = tpu.reciprocal %50 {approx = true} : vector<8x1xf32> -> vector<8x1xf32>
    %52 = vector.broadcast %51 : vector<8x1xf32> to vector<8x8xf32>
    %53 = arith.mulf %48, %52 : vector<8x8xf32>
    %54 = arith.truncf %53 : vector<8x8xf32> to vector<8x8xbf16>
    %cst_21 = arith.constant dense<0.000000e+00> : vector<8x8xf32>
    %55 = tpu.matmul %54, %40, %cst_21 {dimension_numbers = #tpu.dot_dimension_numbers<[1], [0], [0], [1], [0, 0, 1, 1], [], []>} : vector<8x8xbf16>, vector<8x8xbf16>, vector<8x8xf32> -> vector<8x8xf32>
    %c0_22 = arith.constant 0 : index
    %c0_23 = arith.constant 0 : index
    %56 = vector.load %arg16[%c0_22, %c0_23] : memref<8x32xf32, #tpu.memory_space<vmem>>, vector<8x8xf32>
    tpu.vector_store %arg16[%c0_22, %c0_23], %55 {strides = array<i32>} : memref<8x32xf32, #tpu.memory_space<vmem>>, vector<8x8xf32>,
    %57 = vector.extract_strided_slice %33 {offsets = [0, 8], sizes = [8, 8], strides = [1, 1]} : vector<8x32xbf16> to vector<8x8xbf16>
    %58 = vector.extract_strided_slice %35 {offsets = [0, 8], sizes = [8, 8], strides = [1, 1]} : vector<8x32xbf16> to vector<8x8xbf16>
    %59 = vector.extract_strided_slice %37 {offsets = [0, 8], sizes = [8, 8], strides = [1, 1]} : vector<8x32xbf16> to vector<8x8xbf16>
    %cst_24 = arith.constant dense<0.000000e+00> : vector<8x8xf32>
    %60 = tpu.matmul %57, %58, %cst_24 {dimension_numbers = #tpu.dot_dimension_numbers<[1], [1], [0], [0], [0, 0, 1, 0], [], []>} : vector<8x8xbf16>, vector<8x8xbf16>, vector<8x8xf32> -> vector<8x8xf32>
    %61 = vector.broadcast %3 : vector<1x8xf32> to vector<8x8xf32>
    %62 = arith.addf %60, %61 : vector<8x8xf32>
    %cst_25 = arith.constant dense<0xFF800000> : vector<8xf32>
    %63 = vector.multi_reduction <maximumf>, %62, %cst_25 [1] : vector<8x8xf32> to vector<8xf32>
    %64 = vector.shape_cast %63 : vector<8xf32> to vector<8x1xf32>
    %65 = vector.broadcast %64 : vector<8x1xf32> to vector<8x8xf32>
    %66 = arith.subf %62, %65 : vector<8x8xf32>
    %67 = math.exp %66 : vector<8x8xf32>
    %cst_26 = arith.constant dense<0.000000e+00> : vector<8xf32>
    %68 = vector.multi_reduction <add>, %67, %cst_26 [1] : vector<8x8xf32> to vector<8xf32>
    %69 = vector.shape_cast %68 : vector<8xf32> to vector<8x1xf32>
    %70 = tpu.reciprocal %69 {approx = true} : vector<8x1xf32> -> vector<8x1xf32>
    %71 = vector.broadcast %70 : vector<8x1xf32> to vector<8x8xf32>
    %72 = arith.mulf %67, %71 : vector<8x8xf32>
    %73 = arith.truncf %72 : vector<8x8xf32> to vector<8x8xbf16>
    %cst_27 = arith.constant dense<0.000000e+00> : vector<8x8xf32>
    %74 = tpu.matmul %73, %59, %cst_27 {dimension_numbers = #tpu.dot_dimension_numbers<[1], [0], [0], [1], [0, 0, 1, 1], [], []>} : vector<8x8xbf16>, vector<8x8xbf16>, vector<8x8xf32> -> vector<8x8xf32>
    %c0_28 = arith.constant 0 : index
    %c8 = arith.constant 8 : index
    %75 = vector.load %arg16[%c0_28, %c8] : memref<8x32xf32, #tpu.memory_space<vmem>>, vector<8x8xf32>
    tpu.vector_store %arg16[%c0_28, %c8], %74 {strides = array<i32>} : memref<8x32xf32, #tpu.memory_space<vmem>>, vector<8x8xf32>,
    %76 = vector.extract_strided_slice %33 {offsets = [0, 16], sizes = [8, 8], strides = [1, 1]} : vector<8x32xbf16> to vector<8x8xbf16>
    %77 = vector.extract_strided_slice %35 {offsets = [0, 16], sizes = [8, 8], strides = [1, 1]} : vector<8x32xbf16> to vector<8x8xbf16>
    %78 = vector.extract_strided_slice %37 {offsets = [0, 16], sizes = [8, 8], strides = [1, 1]} : vector<8x32xbf16> to vector<8x8xbf16>
    %cst_29 = arith.constant dense<0.000000e+00> : vector<8x8xf32>
    %79 = tpu.matmul %76, %77, %cst_29 {dimension_numbers = #tpu.dot_dimension_numbers<[1], [1], [0], [0], [0, 0, 1, 0], [], []>} : vector<8x8xbf16>, vector<8x8xbf16>, vector<8x8xf32> -> vector<8x8xf32>
    %80 = vector.broadcast %3 : vector<1x8xf32> to vector<8x8xf32>
    %81 = arith.addf %79, %80 : vector<8x8xf32>
    %cst_30 = arith.constant dense<0xFF800000> : vector<8xf32>
    %82 = vector.multi_reduction <maximumf>, %81, %cst_30 [1] : vector<8x8xf32> to vector<8xf32>
    %83 = vector.shape_cast %82 : vector<8xf32> to vector<8x1xf32>
    %84 = vector.broadcast %83 : vector<8x1xf32> to vector<8x8xf32>
    %85 = arith.subf %81, %84 : vector<8x8xf32>
    %86 = math.exp %85 : vector<8x8xf32>
    %cst_31 = arith.constant dense<0.000000e+00> : vector<8xf32>
    %87 = vector.multi_reduction <add>, %86, %cst_31 [1] : vector<8x8xf32> to vector<8xf32>
    %88 = vector.shape_cast %87 : vector<8xf32> to vector<8x1xf32>
    %89 = tpu.reciprocal %88 {approx = true} : vector<8x1xf32> -> vector<8x1xf32>
    %90 = vector.broadcast %89 : vector<8x1xf32> to vector<8x8xf32>
    %91 = arith.mulf %86, %90 : vector<8x8xf32>
    %92 = arith.truncf %91 : vector<8x8xf32> to vector<8x8xbf16>
    %cst_32 = arith.constant dense<0.000000e+00> : vector<8x8xf32>
    %93 = tpu.matmul %92, %78, %cst_32 {dimension_numbers = #tpu.dot_dimension_numbers<[1], [0], [0], [1], [0, 0, 1, 1], [], []>} : vector<8x8xbf16>, vector<8x8xbf16>, vector<8x8xf32> -> vector<8x8xf32>
    %c0_33 = arith.constant 0 : index
    %c16 = arith.constant 16 : index
    %94 = vector.load %arg16[%c0_33, %c16] : memref<8x32xf32, #tpu.memory_space<vmem>>, vector<8x8xf32>
    tpu.vector_store %arg16[%c0_33, %c16], %93 {strides = array<i32>} : memref<8x32xf32, #tpu.memory_space<vmem>>, vector<8x8xf32>,
    %95 = vector.extract_strided_slice %33 {offsets = [0, 24], sizes = [8, 8], strides = [1, 1]} : vector<8x32xbf16> to vector<8x8xbf16>
    %96 = vector.extract_strided_slice %35 {offsets = [0, 24], sizes = [8, 8], strides = [1, 1]} : vector<8x32xbf16> to vector<8x8xbf16>
    %97 = vector.extract_strided_slice %37 {offsets = [0, 24], sizes = [8, 8], strides = [1, 1]} : vector<8x32xbf16> to vector<8x8xbf16>
    %cst_34 = arith.constant dense<0.000000e+00> : vector<8x8xf32>
    %98 = tpu.matmul %95, %96, %cst_34 {dimension_numbers = #tpu.dot_dimension_numbers<[1], [1], [0], [0], [0, 0, 1, 0], [], []>} : vector<8x8xbf16>, vector<8x8xbf16>, vector<8x8xf32> -> vector<8x8xf32>
    %99 = vector.broadcast %3 : vector<1x8xf32> to vector<8x8xf32>
    %100 = arith.addf %98, %99 : vector<8x8xf32>
    %cst_35 = arith.constant dense<0xFF800000> : vector<8xf32>
    %101 = vector.multi_reduction <maximumf>, %100, %cst_35 [1] : vector<8x8xf32> to vector<8xf32>
    %102 = vector.shape_cast %101 : vector<8xf32> to vector<8x1xf32>
    %103 = vector.broadcast %102 : vector<8x1xf32> to vector<8x8xf32>
    %104 = arith.subf %100, %103 : vector<8x8xf32>
    %105 = math.exp %104 : vector<8x8xf32>
    %cst_36 = arith.constant dense<0.000000e+00> : vector<8xf32>
    %106 = vector.multi_reduction <add>, %105, %cst_36 [1] : vector<8x8xf32> to vector<8xf32>
    %107 = vector.shape_cast %106 : vector<8xf32> to vector<8x1xf32>
    %108 = tpu.reciprocal %107 {approx = true} : vector<8x1xf32> -> vector<8x1xf32>
    %109 = vector.broadcast %108 : vector<8x1xf32> to vector<8x8xf32>
    %110 = arith.mulf %105, %109 : vector<8x8xf32>
    %111 = arith.truncf %110 : vector<8x8xf32> to vector<8x8xbf16>
    %cst_37 = arith.constant dense<0.000000e+00> : vector<8x8xf32>
    %112 = tpu.matmul %111, %97, %cst_37 {dimension_numbers = #tpu.dot_dimension_numbers<[1], [0], [0], [1], [0, 0, 1, 1], [], []>} : vector<8x8xbf16>, vector<8x8xbf16>, vector<8x8xf32> -> vector<8x8xf32>
    %c0_38 = arith.constant 0 : index
    %c24 = arith.constant 24 : index
    %113 = vector.load %arg16[%c0_38, %c24] : memref<8x32xf32, #tpu.memory_space<vmem>>, vector<8x8xf32>
    tpu.vector_store %arg16[%c0_38, %c24], %112 {strides = array<i32>} : memref<8x32xf32, #tpu.memory_space<vmem>>, vector<8x8xf32>,
    %c0_39 = arith.constant 0 : index
    %c0_40 = arith.constant 0 : index
    %114 = vector.load %arg16[%c0_39, %c0_40] : memref<8x32xf32, #tpu.memory_space<vmem>>, vector<8x32xf32>
    %115 = arith.truncf %114 : vector<8x32xf32> to vector<8x32xbf16>
    %c0_41 = arith.constant 0 : index
    %c0_42 = arith.constant 0 : index
    %116 = vector.load %arg7[%c0_41, %c0_42] : memref<32x32xbf16, #tpu.memory_space<vmem>>, vector<32x32xbf16>
    %cst_43 = arith.constant dense<0.000000e+00> : vector<8x32xf32>
    %117 = tpu.matmul %115, %116, %cst_43 {dimension_numbers = #tpu.dot_dimension_numbers<[1], [0], [0], [1], [0, 0, 1, 1], [], []>} : vector<8x32xbf16>, vector<32x32xbf16>, vector<8x32xf32> -> vector<8x32xf32>
    %c0_44 = arith.constant 0 : index
    %c0_45 = arith.constant 0 : index
    %118 = vector.load %arg8[%c0_44, %c0_45] : memref<1x32xf32, #tpu.memory_space<vmem>>, vector<1x32xf32>
    %119 = vector.broadcast %118 : vector<1x32xf32> to vector<8x32xf32>
    %120 = arith.addf %117, %119 : vector<8x32xf32>
    %121 = arith.addf %1, %120 : vector<8x32xf32>
    %c0_46 = arith.constant 0 : index
    %c0_47 = arith.constant 0 : index
    %122 = vector.load %arg9[%c0_46, %c0_47] : memref<1x32xf32, #tpu.memory_space<vmem>>, vector<1x32xf32>
    %c0_48 = arith.constant 0 : index
    %c0_49 = arith.constant 0 : index
    %123 = vector.load %arg10[%c0_48, %c0_49] : memref<1x32xf32, #tpu.memory_space<vmem>>, vector<1x32xf32>
    %cst_50 = arith.constant dense<0.000000e+00> : vector<8xf32>
    %124 = vector.multi_reduction <add>, %121, %cst_50 [1] : vector<8x32xf32> to vector<8xf32>
    %125 = vector.shape_cast %124 : vector<8xf32> to vector<8x1xf32>
    %cst_51 = arith.constant 3.200000e+01 : f32
    %126 = vector.broadcast %cst_51 : f32 to vector<8x1xf32>
    %127 = arith.divf %125, %126 : vector<8x1xf32>
    %128 = vector.broadcast %127 : vector<8x1xf32> to vector<8x32xf32>
    %129 = arith.subf %121, %128 : vector<8x32xf32>
    %130 = arith.mulf %129, %129 : vector<8x32xf32>
    %cst_52 = arith.constant dense<0.000000e+00> : vector<8xf32>
    %131 = vector.multi_reduction <add>, %130, %cst_52 [1] : vector<8x32xf32> to vector<8xf32>
    %132 = vector.shape_cast %131 : vector<8xf32> to vector<8x1xf32>
    %cst_53 = arith.constant 3.200000e+01 : f32
    %133 = vector.broadcast %cst_53 : f32 to vector<8x1xf32>
    %134 = arith.divf %132, %133 : vector<8x1xf32>
    %cst_54 = arith.constant 9.99999997E-7 : f32
    %135 = vector.broadcast %cst_54 : f32 to vector<8x1xf32>
    %136 = arith.addf %134, %135 : vector<8x1xf32>
    %137 = math.rsqrt %136 : vector<8x1xf32>
    %138 = vector.broadcast %137 : vector<8x1xf32> to vector<8x32xf32>
    %139 = arith.mulf %129, %138 : vector<8x32xf32>
    %140 = vector.broadcast %122 : vector<1x32xf32> to vector<8x32xf32>
    %141 = arith.mulf %139, %140 : vector<8x32xf32>
    %142 = vector.broadcast %123 : vector<1x32xf32> to vector<8x32xf32>
    %143 = arith.addf %141, %142 : vector<8x32xf32>
    %144 = arith.truncf %143 : vector<8x32xf32> to vector<8x32xbf16>
    %c0_55 = arith.constant 0 : index
    %c0_56 = arith.constant 0 : index
    %145 = vector.load %arg11[%c0_55, %c0_56] : memref<32x128xbf16, #tpu.memory_space<vmem>>, vector<32x128xbf16>
    %cst_57 = arith.constant dense<0.000000e+00> : vector<8x128xf32>
    %146 = tpu.matmul %144, %145, %cst_57 {dimension_numbers = #tpu.dot_dimension_numbers<[1], [0], [0], [1], [0, 0, 1, 1], [], []>} : vector<8x32xbf16>, vector<32x128xbf16>, vector<8x128xf32> -> vector<8x128xf32>
    %c0_58 = arith.constant 0 : index
    %c0_59 = arith.constant 0 : index
    %147 = vector.load %arg12[%c0_58, %c0_59] : memref<1x128xf32, #tpu.memory_space<vmem>>, vector<1x128xf32>
    %148 = vector.broadcast %147 : vector<1x128xf32> to vector<8x128xf32>
    %149 = arith.addf %146, %148 : vector<8x128xf32>
    %cst_60 = arith.constant 5.000000e-01 : f32
    %150 = vector.broadcast %cst_60 : f32 to vector<8x128xf32>
    %151 = arith.mulf %150, %149 : vector<8x128xf32>
    %cst_61 = arith.constant 0.707106769 : f32
    %152 = vector.broadcast %cst_61 : f32 to vector<8x128xf32>
    %153 = arith.mulf %149, %152 : vector<8x128xf32>
    %154 = math.erf %153 : vector<8x128xf32>
    %cst_62 = arith.constant 1.000000e+00 : f32
    %155 = vector.broadcast %cst_62 : f32 to vector<8x128xf32>
    %156 = arith.addf %155, %154 : vector<8x128xf32>
    %157 = arith.mulf %151, %156 : vector<8x128xf32>
    %158 = arith.truncf %157 : vector<8x128xf32> to vector<8x128xbf16>
    %c0_63 = arith.constant 0 : index
    %c0_64 = arith.constant 0 : index
    %159 = vector.load %arg13[%c0_63, %c0_64] : memref<128x32xbf16, #tpu.memory_space<vmem>>, vector<128x32xbf16>
    %cst_65 = arith.constant dense<0.000000e+00> : vector<8x32xf32>
    %160 = tpu.matmul %158, %159, %cst_65 {dimension_numbers = #tpu.dot_dimension_numbers<[1], [0], [0], [1], [0, 0, 1, 1], [], []>} : vector<8x128xbf16>, vector<128x32xbf16>, vector<8x32xf32> -> vector<8x32xf32>
    %c0_66 = arith.constant 0 : index
    %c0_67 = arith.constant 0 : index
    %161 = vector.load %arg14[%c0_66, %c0_67] : memref<1x32xf32, #tpu.memory_space<vmem>>, vector<1x32xf32>
    %162 = vector.broadcast %161 : vector<1x32xf32> to vector<8x32xf32>
    %163 = arith.addf %160, %162 : vector<8x32xf32>
    %164 = arith.addf %121, %163 : vector<8x32xf32>
    %165 = vector.shape_cast %164 : vector<8x32xf32> to vector<1x8x32xf32>
    %c0_68 = arith.constant 0 : index
    %c0_69 = arith.constant 0 : index
    %c0_70 = arith.constant 0 : index
    %166 = vector.load %arg15[%c0_68, %c0_69, %c0_70] : memref<1x8x32xf32, #tpu.memory_space<vmem>>, vector<1x8x32xf32>
    tpu.vector_store %arg15[%c0_68, %c0_69, %c0_70], %165 {strides = array<i32>} : memref<1x8x32xf32, #tpu.memory_space<vmem>>, vector<1x8x32xf32>,
    return
  }
  func.func @transform_0(%arg0: i32) -> (i32, i32, i32) {
    %c0_i32 = arith.constant 0 : i32
    %c0_i32_0 = arith.constant 0 : i32
    %c0_i32_1 = arith.constant 0 : i32
    return %arg0, %c0_i32, %c0_i32_0 : i32, i32, i32
  }
  func.func @transform_1(%arg0: i32) -> (i32, i32, i32) {
    %c0_i32 = arith.constant 0 : i32
    %c0_i32_0 = arith.constant 0 : i32
    %c0_i32_1 = arith.constant 0 : i32
    return %arg0, %c0_i32, %c0_i32_0 : i32, i32, i32
  }
  func.func @transform_2(%arg0: i32) -> (i32, i32) {
    %c0_i32 = arith.constant 0 : i32
    %c0_i32_0 = arith.constant 0 : i32
    %c0_i32_1 = arith.constant 0 : i32
    return %c0_i32, %c0_i32_0 : i32, i32
  }
  func.func @transform_3(%arg0: i32) -> (i32, i32) {
    %c0_i32 = arith.constant 0 : i32
    %c0_i32_0 = arith.constant 0 : i32
    %c0_i32_1 = arith.constant 0 : i32
    return %c0_i32, %c0_i32_0 : i32, i32
  }
  func.func @transform_4(%arg0: i32) -> (i32, i32) {
    %c0_i32 = arith.constant 0 : i32
    %c0_i32_0 = arith.constant 0 : i32
    %c0_i32_1 = arith.constant 0 : i32
    return %c0_i32, %c0_i32_0 : i32, i32
  }
  func.func @transform_5(%arg0: i32) -> (i32, i32) {
    %c0_i32 = arith.constant 0 : i32
    %c0_i32_0 = arith.constant 0 : i32
    %c0_i32_1 = arith.constant 0 : i32
    return %c0_i32, %c0_i32_0 : i32, i32
  }
  func.func @transform_6(%arg0: i32) -> (i32, i32) {
    %c0_i32 = arith.constant 0 : i32
    %c0_i32_0 = arith.constant 0 : i32
    %c0_i32_1 = arith.constant 0 : i32
    return %c0_i32, %c0_i32_0 : i32, i32
  }
  func.func @transform_7(%arg0: i32) -> (i32, i32) {
    %c0_i32 = arith.constant 0 : i32
    %c0_i32_0 = arith.constant 0 : i32
    %c0_i32_1 = arith.constant 0 : i32
    return %c0_i32, %c0_i32_0 : i32, i32
  }
  func.func @transform_8(%arg0: i32) -> (i32, i32) {
    %c0_i32 = arith.constant 0 : i32
    %c0_i32_0 = arith.constant 0 : i32
    %c0_i32_1 = arith.constant 0 : i32
    return %c0_i32, %c0_i32_0 : i32, i32
  }
  func.func @transform_9(%arg0: i32) -> (i32, i32) {
    %c0_i32 = arith.constant 0 : i32
    %c0_i32_0 = arith.constant 0 : i32
    %c0_i32_1 = arith.constant 0 : i32
    return %c0_i32, %c0_i32_0 : i32, i32
  }
  func.func @transform_10(%arg0: i32) -> (i32, i32) {
    %c0_i32 = arith.constant 0 : i32
    %c0_i32_0 = arith.constant 0 : i32
    %c0_i32_1 = arith.constant 0 : i32
    return %c0_i32, %c0_i32_0 : i32, i32
  }
  func.func @transform_11(%arg0: i32) -> (i32, i32) {
    %c0_i32 = arith.constant 0 : i32
    %c0_i32_0 = arith.constant 0 : i32
    %c0_i32_1 = arith.constant 0 : i32
    return %c0_i32, %c0_i32_0 : i32, i32
  }
  func.func @transform_12(%arg0: i32) -> (i32, i32) {
    %c0_i32 = arith.constant 0 : i32
    %c0_i32_0 = arith.constant 0 : i32
    %c0_i32_1 = arith.constant 0 : i32
    return %c0_i32, %c0_i32_0 : i32, i32
  }
  func.func @transform_13(%arg0: i32) -> (i32, i32) {
    %c0_i32 = arith.constant 0 : i32
    %c0_i32_0 = arith.constant 0 : i32
    %c0_i32_1 = arith.constant 0 : i32
    return %c0_i32, %c0_i32_0 : i32, i32
  }
  func.func @transform_14(%arg0: i32) -> (i32, i32, i32) {
    %c0_i32 = arith.constant 0 : i32
    %c0_i32_0 = arith.constant 0 : i32
    %c0_i32_1 = arith.constant 0 : i32
    return %arg0, %c0_i32, %c0_i32_0 : i32, i32, i32
  }
}

</mosaic_0001>

<bundles_post_ra>
// kernel: tpu_custom_call.1
= control target key start
LH: loop header
LB: loop body
LE: loop exit
PB: predicated region body
PF: predicated region fallthrough
CT: control target
= control target key end

     0   :  { %s1800_s0 = inlined_call_operand.hbm [shape: f32[2,8,32], index: 0, kind: input, shape index: {}, may-alias: {0,14}]   ;;  %s1801_s1 = inlined_call_operand.vmem [shape: f32[2,1,8], index: 1, kind: input, shape index: {}]   ;;  %s1802_s2 = inlined_call_operand.vmem [shape: f32[1,32], index: 2, kind: input, shape index: {}]   ;;  %s1803_s3 = inlined_call_operand.vmem [shape: f32[1,32], index: 3, kind: input, shape index: {}]   ;;  %s1804_s4 = inlined_call_operand.vmem [shape: bf16[32,96], index: 4, kind: input, shape index: {}]   ;;  %s1805_s5 = inlined_call_operand.vmem [shape: f32[1,96], index: 5, kind: input, shape index: {}]   ;;  %s1806_s6 = inlined_call_operand.vmem [shape: bf16[32,32], index: 6, kind: input, shape index: {}]   ;;  %s1807_s7 = inlined_call_operand.vmem [shape: f32[1,32], index: 7, kind: input, shape index: {}]   ;;  %s1808_s8 = inlined_call_operand.vmem [shape: f32[1,32], index: 8, kind: input, shape index: {}]   ;;  %s1809_s9 = inlined_call_operand.vmem [shape: f32[1,32], index: 9, kind: input, shape index: {}]   ;;  %s1810_s10 = inlined_call_operand.vmem [shape: bf16[32,128], index: 10, kind: input, shape index: {}]   ;;  %s1811_s11 = inlined_call_operand.vmem [shape: f32[1,128], index: 11, kind: input, shape index: {}]   ;;  %s1812_s12 = inlined_call_operand.vmem [shape: bf16[128,32], index: 12, kind: input, shape index: {}]   ;;  %s1813_s13 = inlined_call_operand.vmem [shape: f32[1,32], index: 13, kind: input, shape index: {}]   ;;  %s1814_s14 = inlined_call_operand.hbm [shape: f32[2,8,32], index: 14, kind: output, shape index: {}, may-alias: {0,14}]  }
   0x1   :  { %1823 = sst [smem:[#allocation15_spill]] %s1813_s13 }
   0x2   :  { %1824 = sst [smem:[#allocation16_spill]] %s1814_s14 }
   0x3   :  { %19 = vsyncpa [#allocation4], 0 }
   0x4   :  { %21 = vsyncpa [#allocation4 + $0x1], 0 }
   0x5   :  { %22 = vsyncpa [#allocation5], 0 }
   0x6   :  { %24 = vsyncpa [#allocation5 + $0x1], 0  ;;  %s1536_s29 = smov 0   ;;  %s1538_s30 = smov 0  }
   0x7   :  { %s1540_s15 = smov 0   ;;  %s1542_s16 = smov 0  }
   0x8 LB: > { %1825 = sst [smem:[#allocation9_spill]] %s1432_s29  ;;  %s1557_s17 = sadd.s32 4294967295, %s1444_s16   ;;  %s1444_s16 = sphi %s1542_s16, %s1842_s16   ;;  %s1440_s15 = sphi %s1540_s15, %s1844_s15   ;;  %s1436_s30 = sphi %s1538_s30, %s1846_s30   ;;  %s1432_s29 = sphi %s1536_s29, %s1845_s29  }
   0x9   : > { %1826 = sst [smem:[#allocation10_spill]] %s1440_s15  ;;  %s1160_s18 = sadd.s32 4294967294, %s1444_s16  }
   0xa   : > { %s1561_s19 = sadd.s32 1, %s1444_s16   ;;  %s37_s20 = sadd.s32 1, %s1440_s15 }
   0xb   : > { %1827 = sst [smem:[#allocation11_spill]] %s1561_s19  ;;  %s34_s21 = ssub.s32 %s1444_s16, %s1561_s19 }
   0xc   : > { %p44_p0 = scmp.ne.s32.totalorder %s1440_s15, %s1436_s30  ;;  %p35_p1 = scmp.eq.s32.totalorder %s34_s21, 0 }
   0xd   : > { %p45_p2 = scmp.eq.s32.totalorder %s1444_s16, 0  ;;  %p50_p3 = scmp.ne.s32.totalorder %s1436_s30, %s1432_s29 }
   0xe   : > { %p51_p4 = scmp.eq.s32.totalorder %s1557_s17, 0  ;;  %p352_p7 = scmp.eq.s32.totalorder %s1557_s17, 1 }
   0xf   : > { %s1573_s22 = scalar_select %p35_p1, %s1440_s15, %s37_s20  }
  0x10   : > { %p1575_p5 = por %p45_p2, %p44_p0  ;;  %p1579_p6 = por %p51_p4, %p50_p3 }
  0x11   : > { %1828 = sst [smem:[#allocation12_spill]] %s1573_s22  ;;  %p358_p8 = scmp.eq.s32.totalorder %s1160_s18, 1 }
  0x12   : > { %p1266_p10 = scmp.lt.s32.totalorder %s1444_s16, 2  ;;  %p1586_p11 = por %p352_p7, %p44_p0 }
  0x13   : > { %p1590_p12 = por %p358_p8, %p50_p3  ;;  %s414_s27 = sand.u32 1, %s1440_s15  }
  0x14   : > { %s1831_s25 = scalar_select %p1586_p11, 1, 0 }
  0x15   : > { %s1833_s26 = scalar_select %p1590_p12, 1, 0 }
  0x16   : > { %1832 = sst [smem:[#allocation13_spill]] %s1831_s25  ;;  %s1164_s28 = sshll.u32 %s1444_s16, 3 }
  0x17   : > { %1834 = sst [smem:[#allocation14_spill]] %s1833_s26  ;;  %s1163_s20 = sshll.u32 %s414_s27, 3 }
  0x18   : > { %s422_s19 = scalar_lea.hbm %s1800_s0, %s1164_s28  ;;  %s418_s18 = scalar_lea.vmem [#allocation3], %s1163_s20 }
  0x19   : > { %s424_s29 = sshll.u32 %s422_s19, 4  ;;  %s426_s14 = sshll.u32 %s418_s18, 4  ;;  %s425_s29 = int_to_ptr.hbm [resolvable:$true] %s424_s29  ;;  %s427_s14 = int_to_ptr.vmem [resolvable:$true] %s426_s14 }
  0x1a   : > { %p1601_p13 = pnand %p1266_p10, %p1575_p5  ;;  %p1165_p0 = scmp.ge.s32.totalorder %s1444_s16, 1 }
  0x1b   : > { %p437_p1 = scmp.lt.s32.totalorder %s1444_s16, 3  ;;  %s415_s15 = scalar_lea.sflag [#allocation4], %s414_s27 }
  0x1c   : > { %s1348_s26 = sshra.s32 %s425_s29, 4  ;;  %p1352_p3 = pneg %p1601_p13  ;;  %s1349_s26 = int_to_ptr.hbm [resolvable:$true] %s1348_s26 }
  0x1d   : > { %s1350_s25 = scalar_lea.hbm %s1349_s26, 8  ;;  %s1355_s23 = scalar_lea.hbm %s1800_s0, 16 }
  0x1e   : > { %p1351_p2 = scmp.ne.s32.totalorder %s1349_s26, %s1350_s25  ;;  %p1356_p5 = scmp.lt.s32.totalorder %s1349_s26, %s1800_s0 }
  0x1f   : > { %p1357_p8 = scmp.lt.s32.totalorder %s1355_s23, %s1350_s25 }
  0x20   : > { %p1353_p4 = pnand %p1352_p3, %p1351_p2 }
  0x21   : > { %p1358_p10 = por %p1357_p8, %p1356_p5 }
  0x22   : > { %p1354_p7 = pneg %p1353_p4 }
  0x24   : > { %p1359_p9 = pnand %p1358_p10, %p1354_p7 }
  0x26   : > { %1362 = shalt.err (!%p1359_p9)
}
  0x27   : > { %1261 = dma.hbm_to_vmem [thread:$0]  (!%p1601_p13), %s425_s29, 128, %s427_s14, %s415_s15  }
  0x28   : > { %p438_p2 = pnand %p1165_p0, %p437_p1 }
  0x29   : > { %s1622_s27 = sand.u32 (!%p438_p2), 1, %s1436_s30  }
  0x2a   : > { %441 = sbr.rel (%p438_p2) target bundleno = 2388 (0x954), region = 76  ;;  %s1166_s25 = sshll.u32 (!%p438_p2), %s1622_s27, 3 }
  0x2b   : > { %s444_s26 = scalar_lea.sflag (!%p438_p2), [#allocation4], %s1622_s27  ;;  %s447_s21 = scalar_lea.vmem (!%p438_p2), [#allocation3], %s1166_s25 }
  0x2f   : > { %1423 = dma.done.wait (%p1579_p6), %s444_s26, 128  }
  0x30   : > { %1425 = vsyncadd (%p1579_p6), %s444_s26, 4294967168  ;;  %vm504_vm0 = vcmask 261120   ;;  %v1632_v0 = vld [vmem:[%s447_s21] sm:$0xff]  ;;  %v1446_v2 = vmov 32.0   ;;  %v1240_v15 = vld [vmem:[%s1804_s4] sm:$0xff]  ;;  %s1447_s20 = smov 88  }
  0x31   : > { %v505_v1 = vsel %vm504_vm0, %v1632_v0, 0.0  ;;  %1324 = vrcp.f32 %v1446_v2  ;;  %v1241_v14 = vld [vmem:[%s1804_s4 + $0x8] sm:$0xff]  ;;  %v1315_v25 = vld [vmem:[%s1802_s2] ss:$0 sm:$0xff]  ;;  %s1448_s26 = smov 64   ;;  %s1449_s21 = smov 96  }
  0x32   : > { %506 = vadd.xlane.f32.xlu0 %v505_v1  ;;  %572 = vmatpush.bf16.msra.mxu0 %v1241_v14  ;;  %v1316_v28 = vld [vmem:[%s1803_s3] ss:$0 sm:$0xff]  ;;  %p496_p6 = scmp.lt.s32.totalorder %s1557_s17, 1  ;;  %s1450_s14 = smov 72   ;;  %vm625_vm5 = vcmask 1043456   ;;  %vm588_vm6 = vcmask 64512  }
  0x33   : > { %v1317_v32 = vld [vmem:[%s1805_s5] ss:$0 sm:$0xff]  ;;  %s1451_s18 = smov 80   ;;  %s1452_s19 = smov 120   ;;  %vm703_vm7 = vcmask 130112   ;;  %vm765_vm8 = vcmask 195712  }
  0x34   : > { %s497_s13 = scalar_select %p496_p6, %s1557_s17, 1  ;;  %vm827_vm9 = vcmask 261312  }
  0x35   : > { %s1453_s22 = smov 104   ;;  %s1454_s23 = smov 112  }
  0x36   : > { %573 = vmatpush.bf16.msra.mxu0 %v1240_v15  ;;  %s498_s24 = scalar_lea.vmem %s1801_s1, %s497_s13  ;;  %s1455_s28 = smov 40  }
  0x37   : > { %v1325_v3 = vpop.eup %1324  ;;  %v1318_v49 = vld [vmem:[%s498_s24] ss:$0 sm:$0xff]  ;;  %s1459_s13 = smov 8   ;;  %s495_s24 = scalar_lea.vmem [#allocation6], %s1166_s25 }
  0x38   : > { %v509_v4 = vmul.f32 32.0, %v1325_v3  ;;  %vm513_vm1 = vweird.f32 %v1325_v3 }
  0x3a   : > { %v510_v5 = vsub.f32 1.0, %v509_v4 }
  0x3c   : > { %v511_v6 = vmul.f32 %v1325_v3, %v510_v5 }
  0x3e   : > { %v512_v7 = vadd.f32 %v1325_v3, %v511_v6 }
  0x40   : > { %v1636_v8 = vsel %vm513_vm1, %v1325_v3, %v512_v7 }
  0xa5   : > { %v507_v9 = vpop.xlane.xlu0 %506 }
  0xa6   : > { %v515_v10 = vmul.f32 %v1636_v8, %v507_v9 }
  0xa8   : > { %v516_v11 = vsub.f32 %v1632_v0, %v515_v10 }
  0xaa   : > { %v517_v12 = vmul.f32 %v516_v11, %v516_v11 }
  0xac   : > { %v518_v13 = vsel %vm504_vm0, %v517_v12, 0.0 }
  0xad   : > { %519 = vadd.xlane.f32.xlu0 %v518_v13 }
 0x120   : > { %v520_v16 = vpop.xlane.xlu0 %519 }
 0x121   : > { %v521_v17 = vmul.f32 %v520_v16, %v1636_v8 }
 0x123   : > { %v522_v18 = vadd.f32 1e-06, %v521_v17 }
 0x125   : > { %1326 = vrsqrt.f32 %v522_v18  ;;  %vm529_vm3 = vweird.f32 %v522_v18 }
 0x12b   : > { %v1327_v19 = vpop.eup %1326 }
 0x12c   : > { %v524_v20 = vmul.f32 %v1327_v19, %v522_v18  ;;  %vm530_vm2 = vweird.f32 %v1327_v19 }
 0x12d   : > { %vm531_vm4 = vmor %vm529_vm3, %vm530_vm2 }
 0x12e   : > { %v525_v21 = vmul.f32 %v1327_v19, %v524_v20 }
 0x130   : > { %v526_v22 = vmul.f32 0.5, %v525_v21 }
 0x132   : > { %v527_v23 = vsub.f32 1.5, %v526_v22 }
 0x134   : > { %v528_v24 = vmul.f32 %v1327_v19, %v527_v23 }
 0x136   : > { %v532_v26 = vsel %vm531_vm4, %v1327_v19, %v528_v24 }
 0x137   : > { %v533_v27 = vmul.f32 %v532_v26, %v516_v11 }
 0x139   : > { %v537_v29 = vmul.f32 %v1315_v25, %v533_v27 }
 0x13b   : > { %v541_v30 = vadd.f32 %v1316_v28, %v537_v29 }
 0x13d   : > { %v542_v31 = vpack.c.bf16 %v541_v30, %v541_v30 }
 0x13f   : > { %1176 = vmatmul.msk.bf16.vlgmr.msra.gmra.mxu0 %vm504_vm0, %v542_v31 }
 0x1bc   : > { %v575_v33 = vpop.f32.mrf.mxu0 }
 0x1bd   : > { %v576_v34 = vadd.f32 %v1317_v32, %v575_v33 }
 0x1bf   : > { %v579_v35 = vpack.c.bf16 %v576_v34, %v576_v34 }
 0x1c1   : > { %v584_v36 = vunpack.c.l.b16 %v579_v35 }
 0x1c3   : > { %v1658_v37 = vpack.c.b16 %v584_v36, %v584_v36 }
 0x1c4   : > { %v577_v38 = vpop.f32.mrf.mxu0 }
 0x1c5   : > { %645 = vrot.lane.b32.xlu0 %v1658_v37, %s1447_s20  ;;  %620 = vrot.lane.b32.xlu2 %v1658_v37, %s1448_s26  ;;  %s1456_s20 = smov 48   ;;  %s1457_s26 = smov 56  }
 0x1c6   : > { %586 = vrot.lane.b32.xlu1 %v1658_v37, %s1449_s21  ;;  %s1458_s21 = smov 16  }
 0x1cd   : > { %769 = vrot.lane.b32.xlu0 %v1658_v37, %s1450_s14  ;;  %s1460_s14 = smov 24  }
 0x1d5   : > { %707 = vrot.lane.b32.xlu0 %v1658_v37, %s1451_s18  ;;  %s1078_s18 = sshll.u32 %s495_s24, 4  ;;  %s1079_s18 = int_to_ptr.vmem [resolvable:$true] %s1078_s18 }
 0x21f   : > { %v621_v39 = vpop.permute.xlu2 %620 }
 0x220   : > { %v627_v40 = vsel %vm625_vm5, %v621_v39, 0 }
 0x221   : > { %636 = vmatpush.bf16.msra.mxu2 %v627_v40 }
 0x237   : > { %v646_v41 = vpop.permute.xlu0 %645 }
 0x238   : > { %v587_v42 = vpop.permute.xlu1 %586  ;;  %v651_v43 = vsel %vm588_vm6, %v646_v41, 0 }
 0x239   : > { %v593_v44 = vsel %vm588_vm6, %v587_v42, 0  ;;  %660 = vmatpush.bf16.xpose.msrb.mxu2 %v651_v43 }
 0x23a   : > { %602 = vmatpush.bf16.xpose.msra.mxu1 %v593_v44 }
 0x23f   : > { %v770_v45 = vpop.permute.xlu0 %769 }
 0x240   : > { %v775_v46 = vsel %vm588_vm6, %v770_v45, 0 }
 0x241   : > { %1177 = vmatmul.msk.bf16.vlgmr.msra.gmra.mxu1 %vm588_vm6, %v579_v35  ;;  %784 = vmatpush.bf16.xpose.msra.mxu3 %v775_v46 }
 0x247   : > { %v708_v47 = vpop.permute.xlu0 %707 }
 0x248   : > { %v713_v48 = vsel %vm588_vm6, %v708_v47, 0 }
 0x249   : > { %722 = vmatpush.bf16.xpose.msrb.mxu0 %v713_v48 }
 0x2be   : > { %v604_v50 = vpop.f32.mrf.mxu1 }
 0x2bf   : > { %v605_v51 = vadd.f32 %v1318_v49, %v604_v50 }
 0x2c1   : > { %v608_v52 = vsel %vm588_vm6, %v605_v51, -inf }
 0x2c2   : > { %609 = vmax.xlane.f32.xlu1 %v608_v52 }
 0x2c6   : > { %v606_v53 = vpop.f32.mrf.mxu1 }
 0x335   : > { %v610_v54 = vpop.xlane.xlu1 %609 }
 0x336   : > { %v611_v55 = vsub.f32 %v605_v51, %v610_v54 }
 0x338   : > { %v612_v56 = vmul.f32 1.442695, %v611_v55 }
 0x33a   : > { %1328 = vpow2.f32 %v612_v56 }
 0x340   : > { %v1329_v57 = vpop.eup %1328 }
 0x341   : > { %v614_v58 = vsel %vm588_vm6, %v1329_v57, 0.0 }
 0x342   : > { %615 = vadd.xlane.f32.xlu2 %v614_v58 }
 0x35a   : > { %643 = vrot.lane.b32.xlu2 %v1658_v37, %s1452_s19 }
 0x362   : > { %767 = vrot.lane.b32.xlu2 %v1658_v37, %s1453_s22 }
 0x36a   : > { %705 = vrot.lane.b32.xlu2 %v1658_v37, %s1454_s23  ;;  %s1237_s23 = sshll.u32 %s1557_s17, 3  ;;  %s1066_s17 = scalar_lea.sflag [#allocation5], %s1622_s27 }
 0x3b5   : > { %v616_v59 = vpop.xlane.xlu2 %615 }
 0x3b6   : > { %1330 = vrcp.f32 %v616_v59 }
 0x3bc   : > { %v1331_v60 = vpop.eup %1330 }
 0x3bd   : > { %v644_v61 = vpop.permute.xlu2 %643  ;;  %v618_v62 = vmul.f32 %v1331_v60, %v1329_v57  ;;  %v1243_v57 = vld [vmem:[%s1806_s6 + $0x8] sm:$0xff]  ;;  %v1242_v60 = vld [vmem:[%s1806_s6] sm:$0xff] }
 0x3be   : > { %860 = vmatpush.bf16.msra.mxu0 %v1243_v57 }
 0x3bf   : > { %v619_v63 = vpack.c.bf16 %v618_v62, %v618_v62 }
 0x3c1   : > { %1178 = vmatmul.msk.bf16.vlgmr.msra.gmra.mxu2 %vm588_vm6, %v619_v63 }
 0x3c2   : > { %861 = vmatpush.bf16.msra.mxu0 %v1242_v60 }
 0x3c5   : > { %v768_v1 = vpop.permute.xlu2 %767 }
 0x3c6   : > { %1183 = vmatmul.msk.bf16.vlgmr.msra.gmra.mxu3 %vm588_vm6, %v768_v1  ;;  %v1319_v1 = vld [vmem:[%s1807_s7] ss:$0 sm:$0xff] }
 0x3cd   : > { %v706_v2 = vpop.permute.xlu2 %705 }
 0x3ce   : > { %1181 = vmatmul.msk.bf16.vlgmr.msrb.gmra.mxu0 %vm588_vm6, %v706_v2 }
 0x3d1   : > { %1179 = vmatmul.msk.bf16.vlgmr.msrb.gmra.mxu2 %vm588_vm6, %v644_v61 }
 0x444   : > { %v638_v3 = vpop.f32.mrf.mxu2 }
 0x445   : > { %642 = vst.msk [vmem:[#allocation2] sm:$0xff] %vm588_vm6, %v638_v3 }
 0x449   : > { %v786_v4 = vpop.f32.mrf.mxu3 }
 0x44a   : > { %v787_v5 = vadd.f32 %v1318_v49, %v786_v4 }
 0x44b   : > { %v724_v6 = vpop.f32.mrf.mxu0 }
 0x44c   : > { %v725_v7 = vadd.f32 %v1318_v49, %v724_v6  ;;  %v640_v9 = vpop.f32.mrf.mxu2  ;;  %v790_v10 = vsel %vm588_vm6, %v787_v5, -inf }
 0x44d   : > { %791 = vmax.xlane.f32.xlu0 %v790_v10 }
 0x44e   : > { %v728_v11 = vsel %vm588_vm6, %v725_v7, -inf }
 0x44f   : > { %729 = vmax.xlane.f32.xlu2 %v728_v11 }
 0x451   : > { %v788_v12 = vpop.f32.mrf.mxu3 }
 0x453   : > { %v726_v13 = vpop.f32.mrf.mxu0 }
 0x454   : > { %v662_v14 = vpop.f32.mrf.mxu2  ;;  %v1245_v13 = vld [vmem:[%s1810_s10 + $0x8] sm:$0xff] }
 0x455   : > { %v663_v15 = vadd.f32 %v1318_v49, %v662_v14 }
 0x457   : > { %v666_v16 = vsel %vm588_vm6, %v663_v15, -inf }
 0x458   : > { %667 = vmax.xlane.f32.xlu1 %v666_v16 }
 0x45c   : > { %v664_v17 = vpop.f32.mrf.mxu2 }
 0x467   : > { %802 = vrot.lane.b32.xlu2 %v1658_v37, %s1455_s28 }
 0x4c0   : > { %v792_v28 = vpop.xlane.xlu0 %791 }
 0x4c1   : > { %v793_v29 = vsub.f32 %v787_v5, %v792_v28 }
 0x4c2   : > { %v730_v18 = vpop.xlane.xlu2 %729 }
 0x4c3   : > { %v731_v19 = vsub.f32 %v725_v7, %v730_v18  ;;  %v794_v30 = vmul.f32 1.442695, %v793_v29  ;;  %v1253_v29 = vld [vmem:[%s1812_s12 + $0x38] sm:$0xff] }
 0x4c4   : > { %1050 = vmatpush.bf16.msrb.mxu3 %v1253_v29 }
 0x4c5   : > { %v732_v20 = vmul.f32 1.442695, %v731_v19 }
 0x4c7   : > { %1332 = vpow2.f32 %v732_v20 }
 0x4ca   : > { %v803_v41 = vpop.permute.xlu2 %802 }
 0x4cb   : > { %v668_v21 = vpop.xlane.xlu1 %667  ;;  %v808_v45 = vsel %vm625_vm5, %v803_v41, 0 }
 0x4cc   : > { %v669_v22 = vsub.f32 %v663_v15, %v668_v21 }
 0x4cd   : > { %v1333_v23 = vpop.eup %1332 }
 0x4ce   : > { %v670_v24 = vmul.f32 1.442695, %v669_v22  ;;  %v734_v25 = vsel %vm588_vm6, %v1333_v23, 0.0 }
 0x4cf   : > { %735 = vadd.xlane.f32.xlu0 %v734_v25 }
 0x4d0   : > { %1334 = vpow2.f32 %v670_v24 }
 0x4d1   : > { %1336 = vpow2.f32 %v794_v30  ;;  %v1252_v30 = vld [vmem:[%s1812_s12 + $0x30] sm:$0xff] }
 0x4d2   : > { %1051 = vmatpush.bf16.msrb.mxu3 %v1252_v30 }
 0x4d6   : > { %v1335_v26 = vpop.eup %1334 }
 0x4d7   : > { %v672_v27 = vsel %vm588_vm6, %v1335_v26, 0.0  ;;  %v1337_v31 = vpop.eup %1336 }
 0x4d8   : > { %673 = vadd.xlane.f32.xlu1 %v672_v27  ;;  %v796_v32 = vsel %vm588_vm6, %v1337_v31, 0.0 }
 0x4e3   : > { %740 = vrot.lane.b32.xlu0 %v1658_v37, %s1456_s20 }
 0x4f1   : > { %678 = vrot.lane.b32.xlu1 %v1658_v37, %s1457_s26  ;;  %s1836_s26 = sld [smem:[#allocation15_spill]] }
 0x51b   : > { %797 = vadd.xlane.f32.xlu1 %v796_v32 }
 0x542   : > { %v736_v33 = vpop.xlane.xlu0 %735 }
 0x543   : > { %1338 = vrcp.f32 %v736_v33  ;;  %v1251_v33 = vld [vmem:[%s1812_s12 + $0x28] sm:$0xff] }
 0x544   : > { %1052 = vmatpush.bf16.msrb.mxu3 %v1251_v33 }
 0x549   : > { %v1339_v34 = vpop.eup %1338 }
 0x54a   : > { %v738_v35 = vmul.f32 %v1339_v34, %v1333_v23  ;;  %v1320_v23 = vld [vmem:[%s1808_s8] ss:$0 sm:$0xff] }
 0x54b   : > { %v674_v38 = vpop.xlane.xlu1 %673 }
 0x54c   : > { %v739_v40 = vpack.c.bf16 %v738_v35, %v738_v35  ;;  %1340 = vrcp.f32 %v674_v38 }
 0x552   : > { %v1341_v37 = vpop.eup %1340 }
 0x553   : > { %v676_v42 = vmul.f32 %v1341_v37, %v1335_v26  ;;  %v1249_v37 = vld [vmem:[%s1812_s12 + $0x18] sm:$0xff] }
 0x555   : > { %v741_v36 = vpop.permute.xlu0 %740  ;;  %v677_v46 = vpack.c.bf16 %v676_v42, %v676_v42 }
 0x556   : > { %v746_v39 = vsel %vm625_vm5, %v741_v36, 0  ;;  %v1250_v36 = vld [vmem:[%s1812_s12 + $0x20] sm:$0xff] }
 0x557   : > { %755 = vmatpush.bf16.msrb.mxu1 %v746_v39  ;;  %1053 = vmatpush.bf16.msrb.mxu3 %v1250_v36 }
 0x55a   : > { %1182 = vmatmul.msk.bf16.vlgmr.msrb.gmra.mxu1 %vm588_vm6, %v739_v40 }
 0x55b   : > { %930 = vmatpush.bf16.msra.mxu1 %v1245_v13  ;;  %1054 = vmatpush.bf16.msrb.mxu3 %v1249_v37 }
 0x563   : > { %v679_v43 = vpop.permute.xlu1 %678 }
 0x564   : > { %v684_v44 = vsel %vm625_vm5, %v679_v43, 0 }
 0x565   : > { %693 = vmatpush.bf16.msra.mxu2 %v684_v44 }
 0x568   : > { %1180 = vmatmul.msk.bf16.vlgmr.msra.gmra.mxu2 %vm588_vm6, %v677_v46 }
 0x569   : > { %817 = vmatpush.bf16.msrb.mxu2 %v808_v45  ;;  %v1248_v45 = vld [vmem:[%s1812_s12 + $0x10] sm:$0xff] }
 0x56a   : > { %1055 = vmatpush.bf16.msrb.mxu3 %v1248_v45 }
 0x58e   : > { %v798_v47 = vpop.xlane.xlu1 %797 }
 0x58f   : > { %1342 = vrcp.f32 %v798_v47 }
 0x595   : > { %v1343_v48 = vpop.eup %1342 }
 0x596   : > { %v800_v49 = vmul.f32 %v1343_v48, %v1337_v31  ;;  %v1322_v31 = vld [vmem:[%s1811_s11] ss:$0 sm:$0xff]  ;;  %v1247_v48 = vld [vmem:[%s1812_s12 + $0x8] sm:$0xff] }
 0x597   : > { %1056 = vmatpush.bf16.msrb.mxu3 %v1247_v48 }
 0x598   : > { %v801_v50 = vpack.c.bf16 %v800_v49, %v800_v49 }
 0x59a   : > { %1184 = vmatmul.msk.bf16.vlgmr.msrb.gmra.mxu2 %vm588_vm6, %v801_v50 }
 0x5d7   : > { %v757_v51 = vpop.f32.mrf.mxu1 }
 0x5d8   : > { %762 = vrot.lane.b32.xlu0 %v757_v51, %s1458_s21 }
 0x5df   : > { %v759_v52 = vpop.f32.mrf.mxu1 }
 0x5e0   : > { %v1246_v52 = vld [vmem:[%s1812_s12] sm:$0xff] }
 0x5e1   : > { %1057 = vmatpush.bf16.msrb.mxu3 %v1246_v52 }
 0x5eb   : > { %v695_v53 = vpop.f32.mrf.mxu2 }
 0x5ec   : > { %700 = vrot.lane.b32.xlu2 %v695_v53, %s1459_s13 }
 0x5f3   : > { %v697_v54 = vpop.f32.mrf.mxu2 }
 0x61d   : > { %v819_v55 = vpop.f32.mrf.mxu2 }
 0x61e   : > { %824 = vrot.lane.b32.xlu2 %v819_v55, %s1460_s14  ;;  %s1837_s14 = sld [smem:[#allocation16_spill]] }
 0x624   : > { %s1076_s15 = scalar_lea.hbm %s1837_s14, %s1237_s23  ;;  %s1398_s25 = scalar_lea.hbm %s1837_s14, 16 }
 0x625   : > { %v821_v56 = vpop.f32.mrf.mxu2  ;;  %s1080_s19 = sshll.u32 %s1076_s15, 4  ;;  %s1081_s19 = int_to_ptr.hbm [resolvable:$true] %s1080_s19 }
 0x626   : > { %s1392_s22 = sshra.s32 %s1081_s19, 4  ;;  %s1393_s22 = int_to_ptr.hbm [resolvable:$true] %s1392_s22 }
 0x627   : > { %s1394_s28 = scalar_lea.hbm %s1393_s22, 8  ;;  %p1399_p1 = scmp.lt.s32.totalorder %s1393_s22, %s1837_s14 }
 0x628   : > { %p1395_p9 = scmp.ne.s32.totalorder %s1393_s22, %s1394_s28  ;;  %p1400_p3 = scmp.lt.s32.totalorder %s1398_s25, %s1394_s28 }
 0x62a   : > { %p1396_p13 = pnand %p1395_p9, %p1586_p11  ;;  %p1401_p4 = por %p1400_p3, %p1399_p1 }
 0x62c   : > { %p1397_p0 = pneg %p1396_p13 }
 0x62e   : > { %p1402_p7 = pnand %p1401_p4, %p1397_p0 }
 0x646   : > { %v701_v58 = vpop.permute.xlu2 %700 }
 0x647   : > { %704 = vst.msk [vmem:[#allocation2] sm:$0xff] %vm703_vm7, %v701_v58 }
 0x64a   : > { %v763_v59 = vpop.permute.xlu0 %762 }
 0x64b   : > { %766 = vst.msk [vmem:[#allocation2] sm:$0xff] %vm765_vm8, %v763_v59 }
 0x678   : > { %v825_v61 = vpop.permute.xlu2 %824 }
 0x679   : > { %828 = vst.msk [vmem:[#allocation2] sm:$0xff] %vm827_vm9, %v825_v61 }
 0x680   : > { %v829_v62 = vld [vmem:[#allocation2] sm:$0xff] }
 0x681   : > { %v830_v63 = vpack.c.bf16 %v829_v62, %v829_v62 }
 0x683   : > { %1193 = vmatmul.msk.bf16.vlgmr.msra.gmra.mxu0 %vm504_vm0, %v830_v63 }
 0x700   : > { %v863_v2 = vpop.f32.mrf.mxu0 }
 0x701   : > { %v864_v3 = vadd.f32 %v1319_v1, %v863_v2 }
 0x703   : > { %v1712_v4 = vadd.f32 %v864_v3, %v1632_v0  ;;  %v1244_v0 = vld [vmem:[%s1810_s10] sm:$0xff] }
 0x704   : > { %931 = vmatpush.bf16.msra.mxu1 %v1244_v0 }
 0x705   : > { %v870_v5 = vsel %vm504_vm0, %v1712_v4, 0.0 }
 0x706   : > { %871 = vadd.xlane.f32.xlu0 %v870_v5 }
 0x708   : > { %v865_v6 = vpop.f32.mrf.mxu0 }
 0x779   : > { %v872_v7 = vpop.xlane.xlu0 %871 }
 0x77a   : > { %v873_v9 = vmul.f32 %v872_v7, %v1636_v8 }
 0x77c   : > { %v874_v10 = vsub.f32 %v1712_v4, %v873_v9 }
 0x77e   : > { %v875_v11 = vmul.f32 %v874_v10, %v874_v10 }
 0x780   : > { %v876_v12 = vsel %vm504_vm0, %v875_v11, 0.0 }
 0x781   : > { %877 = vadd.xlane.f32.xlu1 %v876_v12 }
 0x7f4   : > { %v878_v14 = vpop.xlane.xlu1 %877 }
 0x7f5   : > { %v879_v15 = vmul.f32 %v878_v14, %v1636_v8  ;;  %v1321_v8 = vld [vmem:[%s1809_s9] ss:$0 sm:$0xff] }
 0x7f7   : > { %v880_v16 = vadd.f32 1e-06, %v879_v15 }
 0x7f9   : > { %1344 = vrsqrt.f32 %v880_v16  ;;  %vm887_vm11 = vweird.f32 %v880_v16 }
 0x7ff   : > { %v1345_v17 = vpop.eup %1344 }
 0x800   : > { %v882_v18 = vmul.f32 %v1345_v17, %v880_v16  ;;  %vm888_vm10 = vweird.f32 %v1345_v17 }
 0x801   : > { %vm889_vm12 = vmor %vm887_vm11, %vm888_vm10 }
 0x802   : > { %v883_v19 = vmul.f32 %v1345_v17, %v882_v18 }
 0x804   : > { %v884_v20 = vmul.f32 0.5, %v883_v19  ;;  %v1323_v19 = vld [vmem:[%s1836_s26] ss:$0 sm:$0xff] }
 0x806   : > { %v885_v21 = vsub.f32 1.5, %v884_v20 }
 0x808   : > { %v886_v22 = vmul.f32 %v1345_v17, %v885_v21 }
 0x80a   : > { %v890_v24 = vsel %vm889_vm12, %v1345_v17, %v886_v22 }
 0x80b   : > { %v891_v25 = vmul.f32 %v890_v24, %v874_v10 }
 0x80d   : > { %v895_v26 = vmul.f32 %v1320_v23, %v891_v25 }
 0x80f   : > { %v899_v27 = vadd.f32 %v1321_v8, %v895_v26 }
 0x811   : > { %v900_v28 = vpack.c.bf16 %v899_v27, %v899_v27 }
 0x813   : > { %1202 = vmatmul.msk.bf16.vlgmr.msra.gmra.mxu1 %vm504_vm0, %v900_v28 }
 0x890   : > { %v933_v32 = vpop.f32.mrf.mxu1 }
 0x891   : > { %v934_v34 = vadd.f32 %v1322_v31, %v933_v32 }
 0x893   : > { %v938_v35 = vmul.f32 0.70710677, %v934_v34  ;;  %v937_v15 = vmul.f32 0.5, %v934_v34 }
 0x895   : > { %v939_v38 = vmul.f32 %v938_v35, %v938_v35 }
 0x897   : > { %v940_v39 = vmin.f32 %v939_v38, 16.0 }
 0x898   : > { %v935_v40 = vpop.f32.mrf.mxu1 }
 0x899   : > { %v941_v41 = vmul.f32 2.1237322e-06, %v940_v39  ;;  %v952_v42 = vmul.f32 3.8918573e-05, %v940_v39 }
 0x89b   : > { %v942_v43 = vadd.f32 0.00028619796, %v941_v41  ;;  %v953_v44 = vadd.f32 0.001143296, %v952_v42 }
 0x89d   : > { %v943_v46 = vmul.f32 %v942_v43, %v940_v39  ;;  %v954_v47 = vmul.f32 %v953_v44, %v940_v39 }
 0x89f   : > { %v955_v49 = vadd.f32 0.014752088, %v954_v47  ;;  %v944_v50 = vadd.f32 0.0036580483, %v943_v46 }
 0x8a1   : > { %v956_v51 = vmul.f32 %v955_v49, %v940_v39  ;;  %v945_v54 = vmul.f32 %v944_v50, %v940_v39 }
 0x8a3   : > { %v957_v53 = vadd.f32 0.112945676, %v956_v51  ;;  %v946_v57 = vadd.f32 0.05243302, %v945_v54 }
 0x8a5   : > { %v958_v55 = vmul.f32 %v957_v53, %v940_v39  ;;  %v947_v60 = vmul.f32 %v946_v57, %v940_v39 }
 0x8a7   : > { %v959_v56 = vadd.f32 0.4994258, %v958_v55  ;;  %v948_v61 = vadd.f32 0.18741608, %v947_v60 }
 0x8a9   : > { %v960_v58 = vmul.f32 %v959_v56, %v940_v39  ;;  %v949_v63 = vmul.f32 %v948_v61, %v940_v39 }
 0x8ab   : > { %v961_v59 = vadd.f32 1.0, %v960_v58  ;;  %v950_v5 = vadd.f32 1.1283791, %v949_v63 }
 0x8ad   : > { %1346 = vrcp.f32 %v961_v59  ;;  %v973_v3 = vand.u32 2147483648, %v961_v59  ;;  %v971_v7 = vand.u32 2147483647, %v961_v59  ;;  %vm967_vm14 = vweird.f32 %v961_v59 }
 0x8ae   : > { %v951_v11 = vmul.f32 %v950_v5, %v938_v35 }
 0x8af   : > { %v974_v10 = vor.u32 1.1754944e-38, %v973_v3  ;;  %vm972_vm1 = vcmp.eq.f32.partialorder %v971_v7, 8.507059e+37 }
 0x8b3   : > { %v1347_v62 = vpop.eup %1346 }
 0x8b4   : > { %v963_v1 = vmul.f32 %v1347_v62, %v961_v59  ;;  %vm968_vm13 = vweird.f32 %v1347_v62 }
 0x8b5   : > { %vm969_vm15 = vmor %vm967_vm14, %vm968_vm13 }
 0x8b6   : > { %v964_v2 = vsub.f32 1.0, %v963_v1 }
 0x8b8   : > { %v965_v6 = vmul.f32 %v1347_v62, %v964_v2 }
 0x8ba   : > { %v966_v9 = vadd.f32 %v1347_v62, %v965_v6 }
 0x8bc   : > { %v970_v12 = vsel %vm969_vm15, %v1347_v62, %v966_v9 }
 0x8bd   : > { %v975_v13 = vsel %vm972_vm1, %v974_v10, %v970_v12 }
 0x8be   : > { %v976_v0 = vmul.f32 %v975_v13, %v951_v11 }
 0x8c0   : > { %v1203_v14 = vclamps-f32 %v976_v0, 1.0 }
 0x8c2   : > { %v979_v16 = vadd.f32 1.0, %v1203_v14 }
 0x8c4   : > { %v980_v17 = vmul.f32 %v979_v16, %v937_v15 }
 0x8c6   : > { %v981_v18 = vpack.c.bf16 %v980_v17, %v980_v17 }
 0x8c8   : > { %1058 = vmatmul.bf16.vlgmr.msrb.gmra.mxu3 %v981_v18 }
 0x94b   : > { %v1059_v20 = vpop.f32.mrf.mxu3 }
 0x94c   : > { %v1060_v21 = vadd.f32 %v1323_v19, %v1059_v20 }
 0x94e   : > { %v1063_v22 = vadd.f32 %v1060_v21, %v1712_v4 }
 0x950   : > { %1064 = vst.msk [vmem:[%s495_s24] sm:$0xff] %vm504_vm0, %v1063_v22 }
 0x951   : > { %1405 = shalt.err (!%p1402_p7)
}
 0x952   : > { %1256 = dma.vmem_to_hbm [thread:$0]  (%p1586_p11), %s1079_s18, 128, %s1081_s19, %s1066_s17  }
 0x953   : > { %v1061_v4 = vpop.f32.mrf.mxu3 }
 0x954 PF: > { %s1839_s27 = sld [smem:[#allocation9_spill]]  ;;  %p1841_p5 = scmp.ge.s32.totalorder %s1444_s16, 2 }
 0x956   : > { %p1263_p8 = pnand %p1841_p5, %p1590_p12 }
 0x958   : > { %p1264_p10 = pneg %p1263_p8 }
 0x95a   : > { %s1092_s15 = sand.u32 1, %s1839_s27  }
 0x95b   : > { %s1093_s24 = scalar_lea.sflag [#allocation5], %s1092_s15 }
 0x95c   : > { %1427 = dma.done.wait (%p1264_p10), %s1093_s24, 128  }
 0x95d   : > { %1429 = vsyncadd (%p1264_p10), %s1093_s24, 4294967168  ;;  %s1842_s16 = sld [smem:[#allocation11_spill]]  ;;  %s1845_s29 = smov %s1436_s30 }
 0x95e   : > { %s1843_s22 = sld [smem:[#allocation10_spill]] }
 0x95f   : > { %s1844_s15 = sld [smem:[#allocation12_spill]] }
 0x963   : > { %p27_p2 = scmp.ge.s32.totalorder %s1842_s16, 4  }
 0x964   : > { %s1846_s30 = smov %s1843_s22 }
 0x965   :  { %29 = sbr.rel (!%p27_p2) target bundleno = 8 (0x8), region = 124 }
 0x96a   :  { %1099 = vsyncpa [#allocation4], 1 }
 0x96b   :  { %1101 = vsyncpa [#allocation4 + $0x1], 1 }
 0x96c   :  { %1102 = vsyncpa [#allocation5], 1 }
 0x96d   :  { %1104 = vsyncpa [#allocation5 + $0x1], 1 }

</bundles_post_ra>
